<compile_context>
chip_gen: v6e
topology: v6e:2x2x1
jax: 0.10.0
libtpu: 0.0.40
codegen_flags: <defaults>
</compile_context>

<pallas_src>
import functools

import jax
import jax.numpy as jnp
from jax import lax
from jax.experimental import pallas as pl
from jax.experimental.pallas import tpu as pltpu


def _sdpa_kernel(*refs, inv_temperature, dropout_rate, has_mask, has_dropout):
    """One (batch, q-tile) step.

    Refs (leading batch axis squeezed by the BlockSpec):
      q_ref:(TQ,D) k_ref:(Lk,D) v_ref:(Lk,Dv)
      [mask_ref:(TQ,Lk) int32]  [bits_ref:(TQ,Lk) uint32]
      out_ref:(TQ,Dv) attn_ref:(TQ,Lk)
    """
    it = iter(refs)
    q_ref = next(it)
    k_ref = next(it)
    v_ref = next(it)
    mask_ref = next(it) if has_mask else None
    bits_ref = next(it) if has_dropout else None
    out_ref = next(it)
    attn_ref = next(it)

    # Fold the 1/temperature scale into q (TQ*D multiplies, not TQ*Lk).
    qv = q_ref[...] * jnp.asarray(inv_temperature, dtype=q_ref.dtype)

    # scores = q @ k^T on the MXU, contracting last dims (no explicit transpose).
    s = lax.dot_general(
        qv, k_ref[...],
        dimension_numbers=(((1,), (1,)), ((), ())),
        preferred_element_type=jnp.float32)

    if has_mask:
        # masked_fill(mask, -inf); fully-masked rows produce NaN exactly like
        # PyTorch's masked_fill(-inf) + softmax.
        s = jnp.where(mask_ref[...] != 0, -jnp.inf, s)

    # Softmax over the key axis (dim=2 of (B, Lq, Lk)).
    m = jnp.max(s, axis=-1, keepdims=True)
    e = jnp.exp(s - m)
    denom = jnp.sum(e, axis=-1, keepdims=True)
    inv = 1.0 / denom                  # (TQ, 1) divides only
    p = e * inv                        # broadcast multiply

    if has_dropout:
        # Inverted dropout driven by externally supplied uniform uint32 bits.
        threshold = jnp.uint32(min(int(dropout_rate * (2 ** 32)), 2 ** 32 - 1))
        keep = bits_ref[...] >= threshold
        p = jnp.where(keep,
                      p * jnp.float32(1.0 / (1.0 - dropout_rate)),
                      jnp.float32(0.0))

    attn_ref[...] = p.astype(attn_ref.dtype)
    out_ref[...] = jnp.dot(p.astype(v_ref.dtype), v_ref[...],
                           preferred_element_type=jnp.float32
                           ).astype(out_ref.dtype)


def _choose_tq(lq):
    """Largest q-tile that divides Lq and keeps the (8,128) block rule happy."""
    for t in (256, 128, 64, 32, 16, 8):
        if lq % t == 0:
            return t
    return lq   # not a multiple of 8 -> use the full extent (always legal)


def scaled_dot_product_attention(q, k, v, mask=None, *, temperature,
                                 dropout_rate=0.1, train=False,
                                 rng_key=None, tq=None):
    """Pallas TPU version of ScaledDotProductAttention.forward.

    Returns (output, attn). train=False corresponds to module.eval()
    (dropout disabled). rng_key drives dropout when train=True.
    """
    B, Lq, D = q.shape
    Bk, Lk, Dk = k.shape
    Bv, Lkv, Dv = v.shape
    assert B == Bk == Bv and Lk == Lkv and D == Dk

    has_mask = mask is not None
    has_dropout = bool(train) and 0.0 < float(dropout_rate) < 1.0

    if tq is None:
        tq = _choose_tq(Lq)
    assert Lq % tq == 0, f"tq={tq} must divide Lq={Lq}"
    n_q_tiles = Lq // tq

    inputs = [q, k, v]
    in_specs = [
        pl.BlockSpec((None, tq, D), lambda b, qi: (b, qi, 0)),
        pl.BlockSpec((None, Lk, D), lambda b, qi: (b, 0, 0)),
        pl.BlockSpec((None, Lk, Dv), lambda b, qi: (b, 0, 0)),
    ]
    if has_mask:
        mask_arr = jnp.broadcast_to(mask, (B, Lq, Lk)).astype(jnp.int32)
        inputs.append(mask_arr)
        in_specs.append(pl.BlockSpec((None, tq, Lk), lambda b, qi: (b, qi, 0)))
    if has_dropout:
        # TODO(synk): PyTorch's dropout RNG stream cannot be reproduced
        # bit-exactly; we use jax.random-generated uniform bits instead.
        if rng_key is None:
            rng_key = jax.random.PRNGKey(0)
        bits = jax.random.bits(rng_key, (B, Lq, Lk), dtype=jnp.uint32)
        inputs.append(bits)
        in_specs.append(pl.BlockSpec((None, tq, Lk), lambda b, qi: (b, qi, 0)))

    out_specs = (
        pl.BlockSpec((None, tq, Dv), lambda b, qi: (b, qi, 0)),
        pl.BlockSpec((None, tq, Lk), lambda b, qi: (b, qi, 0)),
    )
    out_shape = (jax.ShapeDtypeStruct((B, Lq, Dv), q.dtype),
                 jax.ShapeDtypeStruct((B, Lq, Lk), q.dtype))

    kernel = functools.partial(
        _sdpa_kernel,
        inv_temperature=1.0 / float(temperature),
        dropout_rate=float(dropout_rate),
        has_mask=has_mask,
        has_dropout=has_dropout,
    )

    bytes_accessed = sum(int(x.size) * x.dtype.itemsize for x in inputs)
    bytes_accessed += B * Lq * Dv * q.dtype.itemsize      # out
    bytes_accessed += B * Lq * Lk * q.dtype.itemsize      # attn
    cost = pl.CostEstimate(
        flops=2 * B * Lq * Lk * (D + Dv),
        transcendentals=B * Lq * Lk,
        bytes_accessed=bytes_accessed,
    )

    out, attn = pl.pallas_call(
        kernel,
        grid=(B, n_q_tiles),
        in_specs=in_specs,
        out_specs=out_specs,
        out_shape=out_shape,
        compiler_params=pltpu.CompilerParams(
            dimension_semantics=("parallel", "parallel"),
            vmem_limit_bytes=64 * 1024 * 1024,
        ),
        cost_estimate=cost,
    )(*inputs)
    return out, attn


if __name__ == "__main__":
    key = jax.random.PRNGKey(0)
    kq, kk, kv, kd = jax.random.split(key, 4)

    B, Lq, Lk, D, Dv = 2, 16, 128, 32, 32
    q = jax.random.normal(kq, (B, Lq, D), dtype=jnp.float32)
    k = jax.random.normal(kk, (B, Lk, D), dtype=jnp.float32)
    v = jax.random.normal(kv, (B, Lk, Dv), dtype=jnp.float32)
    temperature = float(D) ** 0.5   # typical value passed at module construction

    # Reference (pure JAX).
    s_ref = jnp.einsum("bqd,bkd->bqk", q, k) / temperature
    p_ref = jax.nn.softmax(s_ref, axis=-1)
    o_ref = jnp.einsum("bqk,bkd->bqd", p_ref, v)

    # 1) eval mode, no mask (dropout is identity); tq=8 -> 2 q-tiles per batch.
    out, attn = scaled_dot_product_attention(
        q, k, v, mask=None, temperature=temperature,
        dropout_rate=0.1, train=False, tq=8)
    jax.block_until_ready((out, attn))
    assert jnp.allclose(attn, p_ref, atol=1e-4, rtol=1e-4)
    assert jnp.allclose(out, o_ref, atol=1e-4, rtol=1e-4)

    # 2) eval mode with a mask (no row fully masked).
    mask = jnp.broadcast_to(jnp.arange(Lk)[None, None, :] >= (Lk // 2),
                            (B, Lq, Lk))
    out_m, attn_m = scaled_dot_product_attention(
        q, k, v, mask=mask, temperature=temperature,
        dropout_rate=0.1, train=False)
    jax.block_until_ready((out_m, attn_m))
    s_m = jnp.where(mask, -jnp.inf, s_ref)
    p_m = jax.nn.softmax(s_m, axis=-1)
    o_m = jnp.einsum("bqk,bkd->bqd", p_m, v)
    assert jnp.allclose(attn_m, p_m, atol=1e-4, rtol=1e-4)
    assert jnp.allclose(out_m, o_m, atol=1e-4, rtol=1e-4)

    # 3) train mode: exercises the in-kernel dropout path.
    out_t, attn_t = scaled_dot_product_attention(
        q, k, v, mask=None, temperature=temperature,
        dropout_rate=0.1, train=True, rng_key=kd)
    jax.block_until_ready((out_t, attn_t))
    assert bool(jnp.all(jnp.isfinite(out_t)))
    assert bool(jnp.all(jnp.isfinite(attn_t)))
    drop_frac = float(jnp.mean((attn_t == 0.0).astype(jnp.float32)))
    assert 0.02 < drop_frac < 0.25   # ~10% of weights dropped

    print("KERNEL_OK")
</pallas_src>

<mosaic_0001>
module attributes {stable_mosaic.version = 11 : i64} {
  func.func @_sdpa_kernel(%arg0: i32, %arg1: i32, %arg2: memref<1x8x32xf32, #tpu.memory_space<vmem>>, %arg3: memref<1x128x32xf32, #tpu.memory_space<vmem>>, %arg4: memref<1x128x32xf32, #tpu.memory_space<vmem>>, %arg5: memref<1x8x32xf32, #tpu.memory_space<vmem>>, %arg6: memref<1x8x128xf32, #tpu.memory_space<vmem>>) attributes {dimension_semantics = [#tpu.dimension_semantics<parallel>, #tpu.dimension_semantics<parallel>], iteration_bounds = array<i64: 2, 2>, scalar_prefetch = 0 : i64, scratch_operands = 0 : i64, tpu.core_type = #tpu.core_type<tc>, window_params = [{transform_indices = @transform_0, window_bounds = array<i64: 1, 8, 32>}, {transform_indices = @transform_1, window_bounds = array<i64: 1, 128, 32>}, {transform_indices = @transform_2, window_bounds = array<i64: 1, 128, 32>}, {transform_indices = @transform_3, window_bounds = array<i64: 1, 8, 32>}, {transform_indices = @transform_4, window_bounds = array<i64: 1, 8, 128>}]} {
    %c0 = arith.constant 0 : index
    %c0_0 = arith.constant 0 : index
    %c0_1 = arith.constant 0 : index
    %0 = vector.load %arg2[%c0, %c0_0, %c0_1] : memref<1x8x32xf32, #tpu.memory_space<vmem>>, vector<1x8x32xf32>
    %1 = vector.shape_cast %0 : vector<1x8x32xf32> to vector<8x32xf32>
    %cst = arith.constant 0.176776692 : f32
    %2 = vector.broadcast %cst : f32 to vector<8x32xf32>
    %3 = arith.mulf %1, %2 : vector<8x32xf32>
    %c0_2 = arith.constant 0 : index
    %c0_3 = arith.constant 0 : index
    %c0_4 = arith.constant 0 : index
    %4 = vector.load %arg3[%c0_2, %c0_3, %c0_4] : memref<1x128x32xf32, #tpu.memory_space<vmem>>, vector<1x128x32xf32>
    %5 = vector.shape_cast %4 : vector<1x128x32xf32> to vector<128x32xf32>
    %cst_5 = arith.constant dense<0.000000e+00> : vector<8x128xf32>
    %6 = tpu.matmul %3, %5, %cst_5 {dimension_numbers = #tpu.dot_dimension_numbers<[1], [1], [0], [0], [0, 0, 1, 0], [], []>} : vector<8x32xf32>, vector<128x32xf32>, vector<8x128xf32> -> vector<8x128xf32>
    %cst_6 = arith.constant dense<0xFF800000> : vector<8xf32>
    %7 = vector.multi_reduction <maximumf>, %6, %cst_6 [1] : vector<8x128xf32> to vector<8xf32>
    %8 = vector.shape_cast %7 : vector<8xf32> to vector<8x1xf32>
    %9 = vector.broadcast %8 : vector<8x1xf32> to vector<8x128xf32>
    %10 = arith.subf %6, %9 : vector<8x128xf32>
    %11 = math.exp %10 : vector<8x128xf32>
    %cst_7 = arith.constant dense<0.000000e+00> : vector<8xf32>
    %12 = vector.multi_reduction <add>, %11, %cst_7 [1] : vector<8x128xf32> to vector<8xf32>
    %13 = vector.shape_cast %12 : vector<8xf32> to vector<8x1xf32>
    %cst_8 = arith.constant 1.000000e+00 : f32
    %14 = vector.broadcast %cst_8 : f32 to vector<8x1xf32>
    %15 = arith.divf %14, %13 : vector<8x1xf32>
    %16 = vector.broadcast %15 : vector<8x1xf32> to vector<8x128xf32>
    %17 = arith.mulf %11, %16 : vector<8x128xf32>
    %c0_9 = arith.constant 0 : index
    %c0_10 = arith.constant 0 : index
    %c0_11 = arith.constant 0 : index
    %18 = vector.load %arg6[%c0_9, %c0_10, %c0_11] : memref<1x8x128xf32, #tpu.memory_space<vmem>>, vector<1x8x128xf32>
    %19 = vector.shape_cast %18 : vector<1x8x128xf32> to vector<8x128xf32>
    %20 = vector.shape_cast %17 : vector<8x128xf32> to vector<1x8x128xf32>
    tpu.vector_store %arg6[%c0_9, %c0_10, %c0_11], %20 {strides = array<i32>} : memref<1x8x128xf32, #tpu.memory_space<vmem>>, vector<1x8x128xf32>,
    %c0_12 = arith.constant 0 : index
    %c0_13 = arith.constant 0 : index
    %c0_14 = arith.constant 0 : index
    %21 = vector.load %arg4[%c0_12, %c0_13, %c0_14] : memref<1x128x32xf32, #tpu.memory_space<vmem>>, vector<1x128x32xf32>
    %22 = vector.shape_cast %21 : vector<1x128x32xf32> to vector<128x32xf32>
    %cst_15 = arith.constant dense<0.000000e+00> : vector<8x32xf32>
    %23 = tpu.matmul %17, %22, %cst_15 {dimension_numbers = #tpu.dot_dimension_numbers<[1], [0], [0], [1], [0, 0, 1, 1], [], []>} : vector<8x128xf32>, vector<128x32xf32>, vector<8x32xf32> -> vector<8x32xf32>
    %c0_16 = arith.constant 0 : index
    %c0_17 = arith.constant 0 : index
    %c0_18 = arith.constant 0 : index
    %24 = vector.load %arg5[%c0_16, %c0_17, %c0_18] : memref<1x8x32xf32, #tpu.memory_space<vmem>>, vector<1x8x32xf32>
    %25 = vector.shape_cast %24 : vector<1x8x32xf32> to vector<8x32xf32>
    %26 = vector.shape_cast %23 : vector<8x32xf32> to vector<1x8x32xf32>
    tpu.vector_store %arg5[%c0_16, %c0_17, %c0_18], %26 {strides = array<i32>} : memref<1x8x32xf32, #tpu.memory_space<vmem>>, vector<1x8x32xf32>,
    return
  }
  func.func @transform_0(%arg0: i32, %arg1: i32) -> (i32, i32, i32) {
    %c0_i32 = arith.constant 0 : i32
    %c0_i32_0 = arith.constant 0 : i32
    return %arg0, %arg1, %c0_i32 : i32, i32, i32
  }
  func.func @transform_1(%arg0: i32, %arg1: i32) -> (i32, i32, i32) {
    %c0_i32 = arith.constant 0 : i32
    %c0_i32_0 = arith.constant 0 : i32
    %c0_i32_1 = arith.constant 0 : i32
    return %arg0, %c0_i32, %c0_i32_0 : i32, i32, i32
  }
  func.func @transform_2(%arg0: i32, %arg1: i32) -> (i32, i32, i32) {
    %c0_i32 = arith.constant 0 : i32
    %c0_i32_0 = arith.constant 0 : i32
    %c0_i32_1 = arith.constant 0 : i32
    return %arg0, %c0_i32, %c0_i32_0 : i32, i32, i32
  }
  func.func @transform_3(%arg0: i32, %arg1: i32) -> (i32, i32, i32) {
    %c0_i32 = arith.constant 0 : i32
    %c0_i32_0 = arith.constant 0 : i32
    return %arg0, %arg1, %c0_i32 : i32, i32, i32
  }
  func.func @transform_4(%arg0: i32, %arg1: i32) -> (i32, i32, i32) {
    %c0_i32 = arith.constant 0 : i32
    %c0_i32_0 = arith.constant 0 : i32
    return %arg0, %arg1, %c0_i32 : i32, i32, i32
  }
}

</mosaic_0001>

<bundles_post_ra>
// kernel: tpu_custom_call.1
= control target key start
LH: loop header
LB: loop body
LE: loop exit
PB: predicated region body
PF: predicated region fallthrough
CT: control target
= control target key end

     0   :  { %10 = vsyncpa [#allocation3], 0  ;;  %s1332_s0 = inlined_call_operand.vmem [shape: f32[2,16,32], index: 0, kind: input, shape index: {}]   ;;  %s1333_s1 = inlined_call_operand.vmem [shape: f32[2,128,32], index: 1, kind: input, shape index: {}]   ;;  %s1334_s2 = inlined_call_operand.vmem [shape: f32[2,128,32], index: 2, kind: input, shape index: {}]   ;;  %s1335_s3 = inlined_call_operand.hbm [shape: f32[2,16,32], index: 3, kind: output, shape index: {0}]   ;;  %s1336_s4 = inlined_call_operand.hbm [shape: f32[2,16,128], index: 4, kind: output, shape index: {1}]  }
   0x1   :  { %12 = vsyncpa [#allocation3 + $0x1], 0 }
   0x2   :  { %13 = vsyncpa [#allocation5], 0 }
   0x3   :  { %15 = vsyncpa [#allocation5 + $0x1], 0  ;;  %s1063_s15 = smov 0   ;;  %s1065_s16 = smov 0  }
   0x4   :  { %s1067_s17 = smov 0   ;;  %s1069_s18 = smov 0  }
   0x5   :  { %s1071_s19 = smov 0   ;;  %s1073_s20 = smov 0  }
   0x6   :  { %s1075_s21 = smov 0   ;;  %s1077_s22 = smov 0  }
   0x7 LB: > { %s684_s23 = sadd.s32 4294967295, %s1032_s22   ;;  %s685_s24 = sadd.s32 4294967294, %s1032_s22   ;;  %s1032_s22 = sphi %s1077_s22, %s21_s22   ;;  %s1028_s21 = sphi %s1075_s21, %s1349_s21   ;;  %s1024_s20 = sphi %s1073_s20, %s1348_s20   ;;  %s1020_s19 = sphi %s1071_s19, %s1347_s19   ;;  %s1016_s18 = sphi %s1069_s18, %s1346_s18   ;;  %s1012_s17 = sphi %s1067_s17, %s1345_s17   ;;  %s1008_s16 = sphi %s1065_s16, %s1344_s16   ;;  %s1004_s15 = sphi %s1063_s15, %s1343_s15  }
   0x8   : > { %s30_s25 = sadd.s32 1, %s1024_s20  ;;  %s33_s26 = sadd.s32 1, %s1028_s21 }
   0x9   : > { %p31_p0 = scmp.ge.s32.totalorder %s30_s25, 2  ;;  %p132_p1 = scmp.ne.s32.totalorder %s1012_s17, %s1008_s16 }
   0xa   : > { %p133_p2 = scmp.eq.s32.totalorder %s684_s23, 3  ;;  %p138_p5 = scmp.ne.s32.totalorder %s1008_s16, %s1004_s15 }
   0xb   : > { %s1351_s25 = smov (%p31_p0, %s30_s25), 0  ;;  %s1353_s26 = smov (!%p31_p0, %s33_s26), %s1028_s21 }
   0xc   : > { %s118_s27 = ssub.s32 %s1024_s20, %s1351_s25  ;;  %p1114_p3 = por %p133_p2, %p132_p1 }
   0xd   : > { %p35_p4 = scmp.ge.s32.totalorder %s1353_s26, 2  ;;  %p139_p6 = scmp.eq.s32.totalorder %s685_s24, 3 }
   0xe   : > { %p688_p7 = scmp.ge.s32.totalorder %s1032_s22, 1  ;;  %p212_p9 = scmp.lt.s32.totalorder %s1032_s22, 5 }
   0xf   : > { %s1355_s26 = smov (%p35_p4, %s1353_s26), 0  ;;  %p1123_p8 = por %p139_p6, %p138_p5 }
  0x10   : > { %s117_s30 = ssub.s32 %s1028_s21, %s1355_s26  ;;  %s122_s5 = sadd.s32 1, %s1012_s17 }
  0x11   : > { %s119_s6 = sor.u32 %s118_s27, %s117_s30  ;;  %p213_p10 = pnand %p688_p7, %p212_p9 }
  0x12   : > { %p120_p11 = scmp.eq.s32.totalorder %s119_s6, 0  ;;  %p256_p12 = scmp.lt.s32.totalorder (!%p213_p10), %s1020_s19, 1 }
  0x13   : > { %216 = sbr.rel (%p213_p10) target bundleno = 802 (0x322), region = 32  ;;  %p258_p13 = scmp.lt.s32.totalorder (!%p213_p10), %s1016_s18, 1 }
  0x14   : > { %s1132_s7 = scalar_select %p120_p11, %s1012_s17, %s122_s5  }
  0x18   : > { %v1034_v0 = vmov 0.0   ;;  %vm1035_vm0 = vmmov 0   ;;  %s1138_s8 = scalar_select %p256_p12, %s1020_s19, 1  ;;  %vm292_vm1 = vcmask 261120  }
  0x19   : > { %758 = vmatprep.subr.mxu0 %v1034_v0  ;;  %790 = vmatprep.mubr.msk.f32.mxu0 %vm1035_vm0, %v1034_v0  ;;  %s259_s13 = scalar_select %p258_p13, %s1016_s18, 1 }
  0x1a   : > { %793 = vmatprep.subr.mxu1 %v1034_v0  ;;  %825 = vmatprep.mubr.msk.f32.mxu1 %vm1035_vm0, %v1034_v0  ;;  %s722_s9 = sshll.u32 %s1138_s8, 7  ;;  %s691_s14 = sshll.u32 %s1138_s8, 1 }
  0x1b   : > { %s1148_s12 = scalar_lea.vmem %s1333_s1, %s722_s9  ;;  %s261_s23 = sadd.s32 %s691_s14, %s259_s13 }
  0x1c   : > { %v291_v1 = vld [vmem:[%s1148_s12 + $0x78] sm:$0xff]  ;;  %v290_v2 = vld [vmem:[%s1148_s12 + $0x70] sm:$0xff]  ;;  %v289_v3 = vld [vmem:[%s1148_s12 + $0x68] sm:$0xff]  ;;  %s692_s24 = sshll.u32 %s261_s23, 3  ;;  %s1209_s11 = scalar_lea.vmem %s1334_s2, %s722_s9 }
  0x1d   : > { %759 = vmatpush3.xpose.msk.msra.mxu0 %vm292_vm1, %v291_v1  ;;  %v288_v4 = vld [vmem:[%s1148_s12 + $0x60] sm:$0xff]  ;;  %v287_v5 = vld [vmem:[%s1148_s12 + $0x58] sm:$0xff]  ;;  %v286_v6 = vld [vmem:[%s1148_s12 + $0x50] sm:$0xff]  ;;  %s263_s5 = scalar_lea.vmem %s1332_s0, %s692_s24  ;;  %s1243_s8 = sand.u32 1, %s1008_s16  }
  0x1e   : > { %760 = vmatprep.subr.mxu0 %v1034_v0  ;;  %v285_v7 = vld [vmem:[%s1148_s12 + $0x48] sm:$0xff]  ;;  %v284_v8 = vld [vmem:[%s1148_s12 + $0x40] sm:$0xff]  ;;  %v283_v9 = vld [vmem:[%s1148_s12 + $0x38] sm:$0xff]  ;;  %s1338_s9 = sshll.u32 %s1243_s8, 3  ;;  %s716_s13 = sshll.u32 %s1020_s19, 1 }
  0x1f   : > { %v282_v10 = vld [vmem:[%s1148_s12 + $0x30] sm:$0xff]  ;;  %v281_v11 = vld [vmem:[%s1148_s12 + $0x28] sm:$0xff]  ;;  %v280_v12 = vld [vmem:[%s1148_s12 + $0x20] sm:$0xff]  ;;  %s1250_s14 = sadd.s32 %s1016_s18, %s716_s13  ;;  %s518_s6 = scalar_lea.sflag [#allocation5], %s1243_s8 }
  0x20   : > { %v279_v13 = vld [vmem:[%s1148_s12 + $0x18] sm:$0xff]  ;;  %v278_v14 = vld [vmem:[%s1148_s12 + $0x10] sm:$0xff]  ;;  %v277_v15 = vld [vmem:[%s1148_s12 + $0x8] sm:$0xff]  ;;  %s1337_s23 = sshll.u32 %s1250_s14, 7 }
  0x21   : > { %761 = vmatpush3.xpose.msk.msra.mxu0 %vm292_vm1, %v290_v2  ;;  %v274_v16 = vld [vmem:[%s263_s5] sm:$0xff]  ;;  %v440_v21 = vld [vmem:[%s1209_s11 + $0x78] sm:$0xff]  ;;  %v439_v22 = vld [vmem:[%s1209_s11 + $0x70] sm:$0xff]  ;;  %s546_s30 = scalar_lea.hbm %s1336_s4, %s1337_s23 }
  0x22   : > { %762 = vmatprep.subr.mxu0 %v1034_v0  ;;  %v276_v17 = vld [vmem:[%s1148_s12] sm:$0xff]  ;;  %v275_v18 = vmul.f32 0.17677669, %v274_v16  ;;  %794 = vmatpush3.msra.mxu1 %v440_v21  ;;  %v438_v23 = vld [vmem:[%s1209_s11 + $0x68] sm:$0xff]  ;;  %v436_v25 = vld [vmem:[%s1209_s11 + $0x58] sm:$0xff]  ;;  %s255_s12 = scalar_lea.vmem [#allocation4], %s1338_s9 }
  0x23   : > { %795 = vmatprep.subr.mxu1 %v1034_v0  ;;  %v437_v24 = vld [vmem:[%s1209_s11 + $0x60] sm:$0xff]  ;;  %v435_v26 = vld [vmem:[%s1209_s11 + $0x50] sm:$0xff]  ;;  %v434_v27 = vld [vmem:[%s1209_s11 + $0x48] sm:$0xff]  ;;  %s548_s5 = sshll.u32 %s255_s12, 4  ;;  %s549_s5 = int_to_ptr.vmem [resolvable:$true] %s548_s5 }
  0x24   : > { %796 = vmatpush3.msra.mxu1 %v439_v22  ;;  %v433_v28 = vld [vmem:[%s1209_s11 + $0x40] sm:$0xff]  ;;  %v432_v33 = vld [vmem:[%s1209_s11 + $0x38] sm:$0xff]  ;;  %v431_v34 = vld [vmem:[%s1209_s11 + $0x30] sm:$0xff]  ;;  %s910_s10 = scalar_lea.vmem %s549_s5, 128 }
  0x25   : > { %763 = vmatpush3.xpose.msk.msra.mxu0 %vm292_vm1, %v289_v3  ;;  %797 = vmatprep.subr.mxu1 %v1034_v0  ;;  %v430_v35 = vld [vmem:[%s1209_s11 + $0x28] sm:$0xff]  ;;  %v429_v36 = vld [vmem:[%s1209_s11 + $0x20] sm:$0xff]  ;;  %v428_v37 = vld [vmem:[%s1209_s11 + $0x18] sm:$0xff]  ;;  %p911_p0 = scmp.ne.s32.totalorder %s549_s5, %s910_s10 }
  0x26   : > { %764 = vmatprep.subr.mxu0 %v1034_v0  ;;  %798 = vmatpush3.msra.mxu1 %v438_v23  ;;  %v427_v38 = vld [vmem:[%s1209_s11 + $0x10] sm:$0xff]  ;;  %v426_v39 = vld [vmem:[%s1209_s11 + $0x8] sm:$0xff]  ;;  %v425_v40 = vld [vmem:[%s1209_s11] sm:$0xff]  ;;  %s1036_s11 = smov [#allocation4]  }
  0x27   : > { %799 = vmatprep.subr.mxu1 %v1034_v0  ;;  %p912_p1 = pnand %p911_p0, %p1114_p3  ;;  %s914_s19 = sshll.u32 %s1036_s11, 4  ;;  %s915_s19 = int_to_ptr.vmem [resolvable:$false] %s914_s19 }
  0x28   : > { %800 = vmatpush3.msra.mxu1 %v437_v24  ;;  %s916_s18 = scalar_lea.vmem %s915_s19, 256  ;;  %p917_p4 = scmp.lt.s32.totalorder %s549_s5, %s915_s19 }
  0x29   : > { %765 = vmatpush3.xpose.msk.msra.mxu0 %vm292_vm1, %v288_v4  ;;  %801 = vmatprep.subr.mxu1 %v1034_v0  ;;  %p913_p2 = pneg %p912_p1  ;;  %p918_p5 = scmp.lt.s32.totalorder %s916_s18, %s910_s10 }
  0x2a   : > { %766 = vmatprep.subr.mxu0 %v1034_v0  ;;  %802 = vmatpush3.msra.mxu1 %v436_v25 }
  0x2b   : > { %803 = vmatprep.subr.mxu1 %v1034_v0  ;;  %p919_p6 = por %p918_p5, %p917_p4 }
  0x2c   : > { %804 = vmatpush3.msra.mxu1 %v435_v26 }
  0x2d   : > { %767 = vmatpush3.xpose.msk.msra.mxu0 %vm292_vm1, %v287_v5  ;;  %805 = vmatprep.subr.mxu1 %v1034_v0  ;;  %p920_p7 = pnand %p919_p6, %p913_p2 }
  0x2e   : > { %768 = vmatprep.subr.mxu0 %v1034_v0  ;;  %806 = vmatpush3.msra.mxu1 %v434_v27 }
  0x2f   : > { %807 = vmatprep.subr.mxu1 %v1034_v0 }
  0x30   : > { %808 = vmatpush3.msra.mxu1 %v433_v28 }
  0x31   : > { %769 = vmatpush3.xpose.msk.msra.mxu0 %vm292_vm1, %v286_v6  ;;  %809 = vmatprep.subr.mxu1 %v1034_v0 }
  0x32   : > { %770 = vmatprep.subr.mxu0 %v1034_v0  ;;  %810 = vmatpush3.msra.mxu1 %v432_v33 }
  0x33   : > { %811 = vmatprep.subr.mxu1 %v1034_v0 }
  0x34   : > { %812 = vmatpush3.msra.mxu1 %v431_v34 }
  0x35   : > { %771 = vmatpush3.xpose.msk.msra.mxu0 %vm292_vm1, %v285_v7  ;;  %813 = vmatprep.subr.mxu1 %v1034_v0 }
  0x36   : > { %772 = vmatprep.subr.mxu0 %v1034_v0  ;;  %814 = vmatpush3.msra.mxu1 %v430_v35 }
  0x37   : > { %815 = vmatprep.subr.mxu1 %v1034_v0 }
  0x38   : > { %816 = vmatpush3.msra.mxu1 %v429_v36 }
  0x39   : > { %773 = vmatpush3.xpose.msk.msra.mxu0 %vm292_vm1, %v284_v8  ;;  %817 = vmatprep.subr.mxu1 %v1034_v0 }
  0x3a   : > { %774 = vmatprep.subr.mxu0 %v1034_v0  ;;  %818 = vmatpush3.msra.mxu1 %v428_v37 }
  0x3b   : > { %819 = vmatprep.subr.mxu1 %v1034_v0 }
  0x3c   : > { %820 = vmatpush3.msra.mxu1 %v427_v38 }
  0x3d   : > { %775 = vmatpush3.xpose.msk.msra.mxu0 %vm292_vm1, %v283_v9  ;;  %821 = vmatprep.subr.mxu1 %v1034_v0 }
  0x3e   : > { %776 = vmatprep.subr.mxu0 %v1034_v0  ;;  %822 = vmatpush3.msra.mxu1 %v426_v39 }
  0x3f   : > { %823 = vmatprep.subr.mxu1 %v1034_v0 }
  0x40   : > { %824 = vmatpush3.msra.mxu1 %v425_v40 }
  0x41   : > { %777 = vmatpush3.xpose.msk.msra.mxu0 %vm292_vm1, %v282_v10 }
  0x42   : > { %778 = vmatprep.subr.mxu0 %v1034_v0 }
  0x45   : > { %779 = vmatpush3.xpose.msk.msra.mxu0 %vm292_vm1, %v281_v11 }
  0x46   : > { %780 = vmatprep.subr.mxu0 %v1034_v0 }
  0x49   : > { %781 = vmatpush3.xpose.msk.msra.mxu0 %vm292_vm1, %v280_v12 }
  0x4a   : > { %782 = vmatprep.subr.mxu0 %v1034_v0 }
  0x4d   : > { %783 = vmatpush3.xpose.msk.msra.mxu0 %vm292_vm1, %v279_v13 }
  0x4e   : > { %784 = vmatprep.subr.mxu0 %v1034_v0 }
  0x51   : > { %785 = vmatpush3.xpose.msk.msra.mxu0 %vm292_vm1, %v278_v14 }
  0x52   : > { %786 = vmatprep.subr.mxu0 %v1034_v0 }
  0x55   : > { %787 = vmatpush3.xpose.msk.msra.mxu0 %vm292_vm1, %v277_v15 }
  0x56   : > { %788 = vmatprep.subr.mxu0 %v1034_v0 }
  0x59   : > { %789 = vmatpush3.xpose.msk.msra.mxu0 %vm292_vm1, %v276_v17 }
  0x5c   : > { %791 = vmatmul.mubr.msk.f32.vlgmr.msra.gmra.mxu0 %vm292_vm1, %v275_v18 }
 0x11c   : > { %v410_v19 = vpop.f32.mrf.mxu0 }
 0x11d   : > { %414 = vmax.xlane.f32.xlu0 %v410_v19 }
 0x11e   : > { %v792_v20 = vpop.f32.mrf.mxu0 }
 0x1a6   : > { %v415_v29 = vpop.xlane.xlu0 %414 }
 0x1a7   : > { %v416_v30 = vsub.f32 %v410_v19, %v415_v29 }
 0x1a9   : > { %v417_v31 = vmul.f32 1.442695, %v416_v30 }
 0x1ab   : > { %906 = vpow2.f32 %v417_v31 }
 0x1b8   : > { %v907_v32 = vpop.eup %906 }
 0x1b9   : > { %419 = vadd.xlane.f32.xlu0 %v907_v32 }
 0x242   : > { %v420_v41 = vpop.xlane.xlu0 %419 }
 0x243   : > { %908 = vrcp.f32 %v420_v41 }
 0x250   : > { %v909_v42 = vpop.eup %908 }
 0x251   : > { %v423_v43 = vmul.f32 %v909_v42, %v907_v32 }
 0x253   : > { %826 = vmatmul.mubr.f32.vlgmr.msra.gmra.mxu1 %v423_v43  ;;  %424 = vst [vmem:[%s255_s12] sm:$0xff] %v423_v43 }
 0x254   : > { %923 = shalt.err (!%p920_p7)
}
 0x255   : > { %s924_s13 = scalar_lea.hbm %s546_s30, 128  ;;  %s928_s27 = scalar_lea.hbm %s1336_s4, 512 }
 0x256   : > { %p925_p9 = scmp.ne.s32.totalorder %s546_s30, %s924_s13  ;;  %p929_p12 = scmp.lt.s32.totalorder %s546_s30, %s1336_s4 }
 0x257   : > { %p930_p13 = scmp.lt.s32.totalorder %s928_s27, %s924_s13 }
 0x258   : > { %p926_p10 = pnand %p925_p9, %p1114_p3 }
 0x259   : > { %p931_p0 = por %p930_p13, %p929_p12 }
 0x25a   : > { %p927_p11 = pneg %p926_p10 }
 0x25c   : > { %p932_p1 = pnand %p931_p0, %p927_p11 }
 0x25e   : > { %935 = shalt.err (!%p932_p1)
}
 0x25f   : > { %829 = dma.vmem_to_hbm [thread:$0]  (%p1114_p3), %s549_s5, 128, %s546_s30, %s518_s6  }
 0x260   : > { %s1341_s10 = sshll.u32 %s1243_s8, 3  ;;  %s1342_s18 = sshll.u32 %s1250_s14, 7 }
 0x261   : > { %s248_s11 = scalar_lea.vmem [#allocation2], %s1341_s10  ;;  %s1278_s9 = scalar_lea.hbm %s1335_s3, %s1342_s18 }
 0x262   : > { %s533_s19 = sshll.u32 %s248_s11, 4  ;;  %s513_s23 = scalar_lea.sflag [#allocation3], %s1243_s8  ;;  %s1280_s19 = int_to_ptr.vmem [resolvable:$true] %s533_s19 }
 0x263   : > { %s936_s30 = scalar_lea.vmem %s1280_s19, 128  ;;  %s1037_s14 = smov [#allocation2]  }
 0x264   : > { %p937_p2 = scmp.ne.s32.totalorder %s1280_s19, %s936_s30  ;;  %s940_s5 = sshll.u32 %s1037_s14, 4  ;;  %s941_s5 = int_to_ptr.vmem [resolvable:$false] %s940_s5 }
 0x265   : > { %s942_s6 = scalar_lea.vmem %s941_s5, 256  ;;  %p943_p6 = scmp.lt.s32.totalorder %s1280_s19, %s941_s5 }
 0x266   : > { %p938_p4 = pnand %p937_p2, %p1114_p3  ;;  %p944_p7 = scmp.lt.s32.totalorder %s942_s6, %s936_s30 }
 0x268   : > { %p939_p5 = pneg %p938_p4  ;;  %p945_p9 = por %p944_p7, %p943_p6 }
 0x26a   : > { %p946_p10 = pnand %p945_p9, %p939_p5 }
 0x313   : > { %v507_v44 = vpop.f32.mrf.mxu1 }
 0x314   : > { %511 = vst.msk [vmem:[%s248_s11] sm:$0xff] %vm292_vm1, %v507_v44 }
 0x315   : > { %v827_v45 = vpop.f32.mrf.mxu1 }
 0x316   : > { %949 = shalt.err (!%p946_p10)
}
 0x317   : > { %s950_s13 = scalar_lea.hbm %s1278_s9, 128  ;;  %s954_s10 = scalar_lea.hbm %s1335_s3, 512 }
 0x318   : > { %p951_p11 = scmp.ne.s32.totalorder %s1278_s9, %s950_s13  ;;  %p955_p0 = scmp.lt.s32.totalorder %s1278_s9, %s1335_s3 }
 0x319   : > { %p956_p1 = scmp.lt.s32.totalorder %s954_s10, %s950_s13 }
 0x31a   : > { %p952_p12 = pnand %p951_p11, %p1114_p3 }
 0x31b   : > { %p957_p2 = por %p956_p1, %p955_p0 }
 0x31c   : > { %p953_p13 = pneg %p952_p12 }
 0x31e   : > { %p958_p4 = pnand %p957_p2, %p953_p13 }
 0x320   : > { %961 = shalt.err (!%p958_p4)
}
 0x321   : > { %828 = dma.vmem_to_hbm [thread:$0]  (%p1114_p3), %s1280_s19, 128, %s1278_s9, %s513_s23  }
 0x322 PF: > { %p839_p5 = scmp.ge.s32.totalorder %s1032_s22, 2  ;;  %s560_s12 = sand.u32 1, %s1004_s15  }
 0x323   : > { %s561_s24 = scalar_lea.sflag [#allocation3], %s560_s12 }
 0x324   : > { %p833_p6 = pnand %p839_p5, %p1123_p8 }
 0x326   : > { %p834_p7 = pneg %p833_p6 }
 0x328   : > { %995 = dma.done.wait (%p834_p7), %s561_s24, 128  }
 0x329   : > { %997 = vsyncadd (%p834_p7), %s561_s24, 4294967168  ;;  %s570_s30 = scalar_lea.sflag [#allocation5], %s560_s12 }
 0x32a   : > { %999 = dma.done.wait (%p834_p7), %s570_s30, 128  }
 0x32b   : > { %1001 = vsyncadd (%p834_p7), %s570_s30, 4294967168  ;;  %s21_s22 = sadd.s32 1, %s1032_s22   ;;  %s1343_s15 = smov %s1008_s16 }
 0x32c   : > { %p18_p9 = scmp.ge.s32.totalorder %s21_s22, 6   ;;  %s1344_s16 = smov %s1012_s17 }
 0x32d   : > { %s1345_s17 = smov %s1132_s7  ;;  %s1346_s18 = smov %s1024_s20 }
 0x32e   : > { %s1347_s19 = smov %s1028_s21  ;;  %s1348_s20 = smov %s1351_s25 }
 0x32f   : > { %s1349_s21 = smov %s1355_s26  ;;  %20 = sbr.rel (!%p18_p9) target bundleno = 7 (0x7), region = 90 }
 0x334   :  { %575 = vsyncpa [#allocation3], 1 }
 0x335   :  { %577 = vsyncpa [#allocation3 + $0x1], 1 }
 0x336   :  { %578 = vsyncpa [#allocation5], 1 }
 0x337   :  { %580 = vsyncpa [#allocation5 + $0x1], 1 }

</bundles_post_ra>
